<compile_context>
chip_gen: v7x
topology: tpu7x:2x2x1
jax: 0.10.0
libtpu: 0.0.40
codegen_flags: <defaults>
</compile_context>

<pallas_src>
import jax
import jax.numpy as jnp
from jax.experimental import pallas as pl
from jax.experimental.pallas import tpu as pltpu


def _round_up(x, m):
    return ((x + m - 1) // m) * m


def _ann_kernel(x_ref, w1_ref, b1_ref, w2_ref, b2_ref, o_ref):
    # x arrives as f32 straight from HBM; cast to the weights' compute dtype
    # on the VPU (huge slack) right before the first MXU pass.
    x = x_ref[...].astype(w1_ref.dtype)
    # h = relu(x @ W1 + b1)   -- bf16 matmul, f32 accumulate, f32 bias/ReLU
    h = jnp.dot(x, w1_ref[...], preferred_element_type=jnp.float32)
    h = jnp.maximum(h + b1_ref[...], 0.0)
    # y = h @ W2 + b2         -- cast h back to bf16 for the second MXU pass
    y = jnp.dot(h.astype(w2_ref.dtype), w2_ref[...],
                preferred_element_type=jnp.float32)
    o_ref[...] = (y + b2_ref[...]).astype(o_ref.dtype)


def prepare_params(w1, b1, w2, b2, *, compute_dtype=jnp.bfloat16):
    """One-time preparation: cast weights to the MXU compute dtype and biases
    to f32 row vectors.  Call once at init, not per forward."""
    w1p = jnp.asarray(w1, compute_dtype)
    w2p = jnp.asarray(w2, compute_dtype)
    b1p = jnp.asarray(b1, jnp.float32).reshape(1, -1)
    b2p = jnp.asarray(b2, jnp.float32).reshape(1, -1)
    return w1p, b1p, w2p, b2p


def _vmem_estimate(TB, n_in, n_hid, n_out, w_bytes):
    # Double-buffered x / out tiles (f32) + weights/biases (Mosaic still
    # allocates 2 buffers even for constant-index blocks) + f32 intermediates.
    tiles = 2 * TB * (n_in + n_out) * 4
    weights = 2 * ((n_in * n_hid + n_hid * n_out) * w_bytes
                   + (n_hid + n_out) * 4)
    interm = TB * (n_hid + n_out) * 4
    return tiles + weights + interm


def _choose_batch_tile(B, n_in, n_hid, n_out, w_bytes,
                       budget=40 * 1024 * 1024):
    if B > 512:
        # Large batch: 512-row tiles (~85% of HBM roofline measured on v6e).
        TB = 512
    else:
        Bp = _round_up(B, 8)
        # Split into 2 grid steps when it stays sublane-aligned so the
        # "parallel" batch axis can use both TensorCores on v7x.
        TB = Bp // 2 if (Bp >= 16 and (Bp // 2) % 8 == 0) else Bp
    # Shrink if the VMEM estimate exceeds budget (keeps v5e/v7x safe).
    while TB > 8 and _vmem_estimate(TB, n_in, n_hid, n_out, w_bytes) > budget:
        TB //= 2
    TB = max(TB, 8)
    return TB, _round_up(B, TB)


def ann_forward(x, params):
    """x: (B, n_input); params = prepare_params(...) -> (B, n_output)."""
    w1, b1, w2, b2 = params
    B, n_in = x.shape
    n_hid = w1.shape[1]
    n_out = w2.shape[1]
    out_dtype = x.dtype
    w_bytes = jnp.dtype(w1.dtype).itemsize

    TB, B_p = _choose_batch_tile(B, n_in, n_hid, n_out, w_bytes)

    # Only the batch dim ever needs padding (feature dims use full-dim blocks).
    xp = x if B_p == B else jnp.pad(x, ((0, B_p - B), (0, 0)))

    est = _vmem_estimate(TB, n_in, n_hid, n_out, w_bytes)
    vmem_limit = int(min(64 << 20, max(32 << 20, 2 * est)))

    # TODO(synk): single-buffer the constant weight/bias blocks
    # (pipeline_mode=pl.Buffered(1)) and add an inner hidden-dim grid axis
    # once n_hidden is large enough that resident weights pressure v7x's
    # 64 MiB VMEM.
    out = pl.pallas_call(
        _ann_kernel,
        out_shape=jax.ShapeDtypeStruct((B_p, n_out), out_dtype),
        grid_spec=pl.GridSpec(
            grid=(B_p // TB,),
            in_specs=[
                # x: tiled over the batch grid axis, streamed as f32.
                pl.BlockSpec((TB, n_in), lambda i: (i, 0)),
                # Weights & biases: constant index maps -> VMEM-resident.
                pl.BlockSpec((n_in, n_hid), lambda i: (0, 0)),
                pl.BlockSpec((1, n_hid), lambda i: (0, 0)),
                pl.BlockSpec((n_hid, n_out), lambda i: (0, 0)),
                pl.BlockSpec((1, n_out), lambda i: (0, 0)),
            ],
            out_specs=pl.BlockSpec((TB, n_out), lambda i: (i, 0)),
        ),
        compiler_params=pltpu.CompilerParams(
            dimension_semantics=("parallel",),
            vmem_limit_bytes=vmem_limit,
        ),
    )(xp, w1, b1, w2, b2)

    return out if B_p == B else out[:B]


def init_params(key, n_input, n_hidden, n_output, dtype=jnp.float32):
    # Mimics nn.Linear's uniform(-1/sqrt(fan_in), 1/sqrt(fan_in)) init.
    k1, k2, k3, k4 = jax.random.split(key, 4)
    bound1 = 1.0 / jnp.sqrt(n_input)
    bound2 = 1.0 / jnp.sqrt(n_hidden)
    w1 = jax.random.uniform(k1, (n_input, n_hidden), dtype, -bound1, bound1)
    b1 = jax.random.uniform(k2, (1, n_hidden), dtype, -bound1, bound1)
    w2 = jax.random.uniform(k3, (n_hidden, n_output), dtype, -bound2, bound2)
    b2 = jax.random.uniform(k4, (1, n_output), dtype, -bound2, bound2)
    return w1, b1, w2, b2


if __name__ == "__main__":
    key = jax.random.PRNGKey(0)
    kx, kp = jax.random.split(key)

    batch, n_input, n_hidden, n_output = 8, 32, 64, 16
    x = jax.random.normal(kx, (batch, n_input), jnp.float32)
    w1, b1, w2, b2 = init_params(kp, n_input, n_hidden, n_output)

    # One-time weight prep (bf16 cast) -- hoisted out of the forward pass.
    params = prepare_params(w1, b1, w2, b2)

    fwd = jax.jit(ann_forward)
    out = jax.block_until_ready(fwd(x, params))

    # Reference in plain JAX with the same bf16 casting the kernel uses
    # (f32 accumulation), so the comparison isolates kernel correctness.
    xb = x.astype(jnp.bfloat16).astype(jnp.float32)
    w1b = w1.astype(jnp.bfloat16).astype(jnp.float32)
    w2b = w2.astype(jnp.bfloat16).astype(jnp.float32)
    h_ref = jnp.maximum(xb @ w1b + b1, 0.0)
    hb = h_ref.astype(jnp.bfloat16).astype(jnp.float32)
    ref = hb @ w2b + b2

    assert out.shape == (batch, n_output)
    assert jnp.allclose(out, ref, atol=2e-3, rtol=2e-3), (
        float(jnp.max(jnp.abs(out - ref))))

    print("KERNEL_OK")
</pallas_src>

<mosaic_0001>
module attributes {stable_mosaic.version = 11 : i64} {
  func.func @_ann_kernel(%arg0: i32, %arg1: memref<8x32xf32, #tpu.memory_space<vmem>>, %arg2: memref<32x64xbf16, #tpu.memory_space<vmem>>, %arg3: memref<1x64xf32, #tpu.memory_space<vmem>>, %arg4: memref<64x16xbf16, #tpu.memory_space<vmem>>, %arg5: memref<1x16xf32, #tpu.memory_space<vmem>>, %arg6: memref<8x16xf32, #tpu.memory_space<vmem>>) attributes {dimension_semantics = [#tpu.dimension_semantics<parallel>], iteration_bounds = array<i64: 1>, scalar_prefetch = 0 : i64, scratch_operands = 0 : i64, tpu.core_type = #tpu.core_type<tc>, window_params = [{transform_indices = @transform_0, window_bounds = array<i64: 8, 32>}, {pipeline_mode = #tpu.pipeline_mode<synchronous>, transform_indices = @transform_1, window_bounds = array<i64: 32, 64>}, {pipeline_mode = #tpu.pipeline_mode<synchronous>, transform_indices = @transform_2, window_bounds = array<i64: 1, 64>}, {pipeline_mode = #tpu.pipeline_mode<synchronous>, transform_indices = @transform_3, window_bounds = array<i64: 64, 16>}, {pipeline_mode = #tpu.pipeline_mode<synchronous>, transform_indices = @transform_4, window_bounds = array<i64: 1, 16>}, {transform_indices = @transform_5, window_bounds = array<i64: 8, 16>}]} {
    %c0 = arith.constant 0 : index
    %c0_0 = arith.constant 0 : index
    %0 = vector.load %arg1[%c0, %c0_0] : memref<8x32xf32, #tpu.memory_space<vmem>>, vector<8x32xf32>
    %1 = arith.truncf %0 : vector<8x32xf32> to vector<8x32xbf16>
    %c0_1 = arith.constant 0 : index
    %c0_2 = arith.constant 0 : index
    %2 = vector.load %arg2[%c0_1, %c0_2] : memref<32x64xbf16, #tpu.memory_space<vmem>>, vector<32x64xbf16>
    %cst = arith.constant dense<0.000000e+00> : vector<8x64xf32>
    %3 = tpu.matmul %1, %2, %cst {dimension_numbers = #tpu.dot_dimension_numbers<[1], [0], [0], [1], [0, 0, 1, 1], [], []>} : vector<8x32xbf16>, vector<32x64xbf16>, vector<8x64xf32> -> vector<8x64xf32>
    %c0_3 = arith.constant 0 : index
    %c0_4 = arith.constant 0 : index
    %4 = vector.load %arg3[%c0_3, %c0_4] : memref<1x64xf32, #tpu.memory_space<vmem>>, vector<1x64xf32>
    %5 = vector.broadcast %4 : vector<1x64xf32> to vector<8x64xf32>
    %6 = arith.addf %3, %5 : vector<8x64xf32>
    %cst_5 = arith.constant 0.000000e+00 : f32
    %7 = vector.broadcast %cst_5 : f32 to vector<8x64xf32>
    %8 = arith.maximumf %6, %7 : vector<8x64xf32>
    %9 = arith.truncf %8 : vector<8x64xf32> to vector<8x64xbf16>
    %c0_6 = arith.constant 0 : index
    %c0_7 = arith.constant 0 : index
    %10 = vector.load %arg4[%c0_6, %c0_7] : memref<64x16xbf16, #tpu.memory_space<vmem>>, vector<64x16xbf16>
    %cst_8 = arith.constant dense<0.000000e+00> : vector<8x16xf32>
    %11 = tpu.matmul %9, %10, %cst_8 {dimension_numbers = #tpu.dot_dimension_numbers<[1], [0], [0], [1], [0, 0, 1, 1], [], []>} : vector<8x64xbf16>, vector<64x16xbf16>, vector<8x16xf32> -> vector<8x16xf32>
    %c0_9 = arith.constant 0 : index
    %c0_10 = arith.constant 0 : index
    %12 = vector.load %arg5[%c0_9, %c0_10] : memref<1x16xf32, #tpu.memory_space<vmem>>, vector<1x16xf32>
    %13 = vector.broadcast %12 : vector<1x16xf32> to vector<8x16xf32>
    %14 = arith.addf %11, %13 : vector<8x16xf32>
    %c0_11 = arith.constant 0 : index
    %c0_12 = arith.constant 0 : index
    %15 = vector.load %arg6[%c0_11, %c0_12] : memref<8x16xf32, #tpu.memory_space<vmem>>, vector<8x16xf32>
    tpu.vector_store %arg6[%c0_11, %c0_12], %14 {strides = array<i32>} : memref<8x16xf32, #tpu.memory_space<vmem>>, vector<8x16xf32>,
    return
  }
  func.func @transform_0(%arg0: i32) -> (i32, i32) {
    %c0_i32 = arith.constant 0 : i32
    %c0_i32_0 = arith.constant 0 : i32
    return %arg0, %c0_i32 : i32, i32
  }
  func.func @transform_1(%arg0: i32) -> (i32, i32) {
    %c0_i32 = arith.constant 0 : i32
    %c0_i32_0 = arith.constant 0 : i32
    %c0_i32_1 = arith.constant 0 : i32
    return %c0_i32, %c0_i32_0 : i32, i32
  }
  func.func @transform_2(%arg0: i32) -> (i32, i32) {
    %c0_i32 = arith.constant 0 : i32
    %c0_i32_0 = arith.constant 0 : i32
    %c0_i32_1 = arith.constant 0 : i32
    return %c0_i32, %c0_i32_0 : i32, i32
  }
  func.func @transform_3(%arg0: i32) -> (i32, i32) {
    %c0_i32 = arith.constant 0 : i32
    %c0_i32_0 = arith.constant 0 : i32
    %c0_i32_1 = arith.constant 0 : i32
    return %c0_i32, %c0_i32_0 : i32, i32
  }
  func.func @transform_4(%arg0: i32) -> (i32, i32) {
    %c0_i32 = arith.constant 0 : i32
    %c0_i32_0 = arith.constant 0 : i32
    %c0_i32_1 = arith.constant 0 : i32
    return %c0_i32, %c0_i32_0 : i32, i32
  }
  func.func @transform_5(%arg0: i32) -> (i32, i32) {
    %c0_i32 = arith.constant 0 : i32
    %c0_i32_0 = arith.constant 0 : i32
    return %arg0, %c0_i32 : i32, i32
  }
}

</mosaic_0001>

<bundles_post_ra>
// kernel: ann_forward.1
= control target key start
LH: loop header
LB: loop body
LE: loop exit
PB: predicated region body
PF: predicated region fallthrough
CT: control target
= control target key end

     0   :  { %v263_v1 = vmov 0.0   ;;  %vm264_vm0 = vmmov 0   ;;  %vm47_vm1 = vcmask 261120   ;;  %s335_s0 = inlined_call_operand.vmem [shape: f32[8,32], index: 0, kind: input, shape index: {}]   ;;  %s336_s1 = inlined_call_operand.vmem [shape: bf16[32,64], index: 1, kind: input, shape index: {}]   ;;  %s337_s2 = inlined_call_operand.vmem [shape: f32[1,64], index: 2, kind: input, shape index: {}]   ;;  %s338_s3 = inlined_call_operand.vmem [shape: bf16[64,16], index: 3, kind: input, shape index: {}]   ;;  %s339_s4 = inlined_call_operand.vmem [shape: f32[1,16], index: 4, kind: input, shape index: {}]   ;;  %s340_s5 = inlined_call_operand.hbm [shape: f32[8,16], index: 5, kind: output, shape index: {}]  }
   0x1   :  { %v233_v0 = vld [vmem:[%s336_s1] sm:$0xff]   ;;  %210 = vmatprep.subr.bf16.mxu0 %v263_v1  ;;  %v234_v2 = vld [vmem:[%s336_s1 + $0x8] sm:$0xff]   ;;  %218 = vmatprep.subr.bf16.mxu1 %v263_v1 }
   0x2   :  { %211 = vmatpush3.bf16.msra.mxu0 %v233_v0  ;;  %214 = vmatprep.mubr.msk.bf16.mxu0 %vm264_vm0, %v263_v1  ;;  %v22_v3 = vld [vmem:[%s335_s0] sm:$0xff]  ;;  %v236_v5 = vld [vmem:[%s338_s3 + $0x8] sm:$0xff]  }
   0x3   :  { %212 = vmatprep.subr.bf16.mxu0 %v263_v1  ;;  %v235_v4 = vld [vmem:[%s338_s3] sm:$0xff]   ;;  %226 = vmatprep.mubr.msk.bf16.mxu1 %vm264_vm0, %v263_v1  ;;  %v23_v6 = vpack.c.bf16 %v22_v3, %v22_v3 }
   0x4   :  { %219 = vmatpush3.bf16.msra.mxu1 %v235_v4 }
   0x5   :  { %220 = vmatprep.subr.bf16.mxu1 %v263_v1 }
   0x6   :  { %213 = vmatpush3.bf16.msra.mxu0 %v234_v2 }
   0x7   :  { %10 = vsyncpa [#allocation3], 0  ;;  %v237_v7 = vld [vmem:[%s338_s3 + $0x10] sm:$0xff]   ;;  %v238_v8 = vld [vmem:[%s338_s3 + $0x18] sm:$0xff]   ;;  %vm132_vm2 = vcmask 523264   ;;  %s265_s9 = smov [#allocation2]  }
   0x8   :  { %221 = vmatpush3.bf16.msra.mxu1 %v236_v5  ;;  %v192_v9 = vld [vmem:[%s337_s2] ss:$0 sm:$0xff]  ;;  %s184_s3 = sshll.u32 %s265_s9, 4  ;;  %vm176_vm3 = vcmask 130048   ;;  %s185_s3 = int_to_ptr.vmem [resolvable:$true] %s184_s3 }
   0x9   :  { %215 = vmatmul.mubr.msk.bf16.vlgmr.msra.gmra.mrb[0].mxu0 %vm47_vm1, %v23_v6  ;;  %222 = vmatprep.subr.bf16.mxu1 %v263_v1  ;;  %v196_v17 = vld [vmem:[%s339_s4] ss:$0 sm:$0xff]  ;;  %s239_s2 = scalar_lea.vmem %s185_s3, 128  ;;  %p244_p1 = scmp.lt.s32.totalorder %s185_s3, %s185_s3 }
   0xa   :  { %p240_p0 = scmp.ne.s32.totalorder %s185_s3, %s239_s2  ;;  %p245_p2 = scmp.lt.s32.totalorder %s239_s2, %s239_s2 }
   0xc   :  { %223 = vmatpush3.bf16.msra.mxu1 %v237_v7  ;;  %p246_p3 = por %p245_p2, %p244_p1 }
   0xd   :  { %224 = vmatprep.subr.bf16.mxu1 %v263_v1 }
   0xe   :  { %p247_p4 = pnand %p246_p3, %p240_p0 }
  0x10   :  { %225 = vmatpush3.bf16.msra.mxu1 %v238_v8 }
  0xdc   :  { %v85_v10 = vpop.f32.mrb[0].mxu0 }
  0xdd   :  { %v86_v11 = vadd.f32 %v192_v9, %v85_v10  ;;  %v216_v12 = vpop.f32.mrb[1].mxu0 }
  0xde   :  { %v88_v13 = vpop.f32.mrb[2].mxu0 }
  0xdf   :  { %v91_v14 = vmax.f32 %v86_v11, 0.0  ;;  %v217_v15 = vpop.f32.mrb[3].mxu0 }
  0xe1   :  { %v92_v16 = vpack.c.bf16 %v91_v14, %v91_v14 }
  0xe3   :  { %227 = vmatmul.mubr.msk.bf16.vlgmr.msra.gmra.mrb[0].mxu1 %vm132_vm2, %v92_v16 }
 0x1b6   :  { %v170_v18 = vpop.f32.mrb[0].mxu1 }
 0x1b7   :  { %v171_v19 = vadd.f32 %v196_v17, %v170_v18  ;;  %v228_v20 = vpop.f32.mrb[1].mxu1 }
 0x1b8   :  { %v173_v21 = vpop.f32.mrb[2].mxu1 }
 0x1b9   :  { %v229_v22 = vpop.f32.mrb[3].mxu1  ;;  %177 = vst.msk [vmem:[#allocation2] sm:$0xff] %vm176_vm3, %v171_v19 }
 0x1ba   :  { %250 = shalt.err (!%p247_p4)
}
 0x1bb   :  { %s251_s4 = scalar_lea.hbm %s340_s5, 128 }
 0x1bc   :  { %p252_p5 = scmp.ne.s32.totalorder %s340_s5, %s251_s4  ;;  %p255_p6 = scmp.lt.u32.totalorder %s251_s4, %s340_s5 }
 0x1be   :  { %p257_p7 = pnand %p255_p6, %p252_p5 }
 0x1c0   :  { %260 = shalt.err (!%p257_p7)
}
 0x1c1   :  { %187 = dma.vmem_to_hbm [thread:$0]  %s185_s3, 128, %s340_s5, [#allocation3]  }
 0x1c2   :  { %261 = dma.done.wait [#allocation3], 128  }
 0x1c3   :  { %262 = vsyncadd [#allocation3], 4294967168 }
 0x1c4   :  { %191 = vsyncpa [#allocation3], 1 }

</bundles_post_ra>
